<compile_context>
chip_gen: v6e
topology: v6e:2x2x1
jax: 0.10.0
libtpu: 0.0.40
codegen_flags: <defaults>
</compile_context>

<pallas_src>
import functools
import math

import jax
import jax.numpy as jnp
from jax.experimental import pallas as pl
from jax.experimental.pallas import tpu as pltpu

LANES = 128      # vreg lane width / padded logits width
HIDDEN = 128     # fc1 output size (fixed by the module)
SUBLANES = 8     # sublane alignment for packed-slab segments and batch rows


def _round_up(n, m):
    return (n + m - 1) // m * m


def _policy_kernel(x_ref, p_ref, o_ref, *, s_pad):
    # Static, 8-row-aligned slices into the packed parameter slab.
    w1 = p_ref[0:s_pad, :]                                              # (s_pad, 128)
    b1 = p_ref[s_pad:s_pad + 1, :]                                      # (1, 128)
    w2 = p_ref[s_pad + SUBLANES:s_pad + SUBLANES + HIDDEN, :]           # (128, 128), zero-padded cols
    b2 = p_ref[s_pad + SUBLANES + HIDDEN:s_pad + SUBLANES + HIDDEN + 1, :]  # (1, 128), -1e30 in padded lanes

    # hidden = relu(x @ W1 + b1)   -- (tb, 128)
    h = jnp.dot(x_ref[...], w1, preferred_element_type=jnp.float32) + b1
    h = jnp.maximum(h, 0.0)

    # logits over the full 128-lane slab; padded lanes are exactly -1e30
    # because the padded W2 columns are zero and b2 carries the mask.
    logits = jnp.dot(h, w2, preferred_element_type=jnp.float32) + b2    # (tb, 128)

    # Numerically stable softmax; padded lanes underflow to exactly 0.
    m = jnp.max(logits, axis=-1, keepdims=True)
    e = jnp.exp(logits - m)
    o_ref[...] = e / jnp.sum(e, axis=-1, keepdims=True)


def pack_params(w1, b1, w2, b2):
    """Pack (W1, b1, W2, b2) into one (rows, 128) f32 slab, 8-row aligned segments.

    Layout:
      rows [0 : s_pad)                    W1 (zero-padded rows), s_pad = round_up(S, 8)
      row  [s_pad]                        b1
      rows [s_pad+8 : s_pad+8+128)        W2 (zero-padded cols)
      row  [s_pad+8+128]                  b2 with -1e30 in padded lanes (softmax mask)
    """
    state_space = w1.shape[0]
    action_space = w2.shape[1]
    s_pad = _round_up(state_space, SUBLANES)
    rows = s_pad + SUBLANES + HIDDEN + SUBLANES
    slab = jnp.zeros((rows, LANES), jnp.float32)
    slab = slab.at[:state_space, :HIDDEN].set(w1.astype(jnp.float32))
    slab = slab.at[s_pad, :HIDDEN].set(b1.reshape(-1).astype(jnp.float32))
    slab = slab.at[s_pad + SUBLANES:s_pad + SUBLANES + HIDDEN, :action_space].set(
        w2.astype(jnp.float32))
    b2_row = jnp.full((LANES,), -1e30, jnp.float32)
    b2_row = b2_row.at[:action_space].set(b2.reshape(-1).astype(jnp.float32))
    slab = slab.at[s_pad + SUBLANES + HIDDEN].set(b2_row)
    return slab


def _pallas_forward(x_pad, packed_params, *, s_pad, tb):
    """x_pad: (M, s_pad) with M % tb == 0, tb % 8 == 0. Returns (M, 128) probs slab."""
    M = x_pad.shape[0]
    rows = packed_params.shape[0]
    kernel = functools.partial(_policy_kernel, s_pad=s_pad)

    cost = pl.CostEstimate(
        flops=int(2 * M * (s_pad * HIDDEN + HIDDEN * LANES)),
        transcendentals=int(M * LANES),
        bytes_accessed=int((rows * LANES + M * s_pad + M * LANES) * 4),
    )

    return pl.pallas_call(
        kernel,
        out_shape=jax.ShapeDtypeStruct((M, LANES), jnp.float32),
        grid_spec=pltpu.PrefetchScalarGridSpec(
            num_scalar_prefetch=0,
            grid=(M // tb,),
            in_specs=[
                # per-step batch tile of states
                pl.BlockSpec((tb, s_pad), lambda i: (i, 0)),
                # constant-index param slab: DMA'd once, stays VMEM-resident
                pl.BlockSpec((rows, LANES), lambda i: (0, 0)),
            ],
            out_specs=pl.BlockSpec((tb, LANES), lambda i: (i, 0)),
        ),
        compiler_params=pltpu.CompilerParams(
            dimension_semantics=("parallel",)),
        cost_estimate=cost,
    )(x_pad, packed_params)


def policy_net_batch(xs, packed_params, *, state_space, action_space):
    """Evaluate the policy for a batch of states. xs: (B, state_space)."""
    s_pad = packed_params.shape[0] - (SUBLANES + HIDDEN + SUBLANES)
    xs = xs.reshape(xs.shape[0], -1).astype(jnp.float32)
    assert xs.shape[1] == state_space, "each row must flatten to state_space"
    B = xs.shape[0]

    # Pad rows to a sublane multiple; use 128-row tiles once the batch is large
    # enough (fills MXU rows, lets the parallel grid axis shard across cores).
    m_pad = _round_up(B, SUBLANES)
    if m_pad > LANES:
        m_pad = _round_up(B, LANES)
    tb = min(m_pad, LANES)

    x_pad = jnp.zeros((m_pad, s_pad), jnp.float32)
    x_pad = x_pad.at[:B, :state_space].set(xs)

    probs_pad = _pallas_forward(x_pad, packed_params, s_pad=s_pad, tb=tb)
    return probs_pad[:B, :action_space]                 # (B, action_space)


def policy_net(x, packed_params, *, state_space, action_space):
    """Module-faithful forward: flattens the whole input to one row (x.view(1, -1))."""
    x_flat = x.reshape(1, -1).astype(jnp.float32)
    return policy_net_batch(x_flat, packed_params,
                            state_space=state_space, action_space=action_space)


def init_params(key, state_space, action_space):
    """Mirror nn.Linear default init: U(-1/sqrt(fan_in), 1/sqrt(fan_in))."""
    k1, k2, k3, k4 = jax.random.split(key, 4)
    bnd1 = 1.0 / math.sqrt(state_space)
    w1 = jax.random.uniform(k1, (state_space, HIDDEN), jnp.float32, -bnd1, bnd1)
    b1 = jax.random.uniform(k2, (HIDDEN,), jnp.float32, -bnd1, bnd1)
    bnd2 = 1.0 / math.sqrt(HIDDEN)
    w2 = jax.random.uniform(k3, (HIDDEN, action_space), jnp.float32, -bnd2, bnd2)
    b2 = jax.random.uniform(k4, (action_space,), jnp.float32, -bnd2, bnd2)
    return w1, b1, w2, b2


if __name__ == "__main__":
    state_space = 32   # flattened input size (x.view(1, -1) -> (1, 32))
    action_space = 4

    key = jax.random.PRNGKey(0)
    kp, kx, kb = jax.random.split(key, 3)
    w1, b1, w2, b2 = init_params(kp, state_space, action_space)
    packed = pack_params(w1, b1, w2, b2)

    # --- single-state forward (exact module semantics) ---
    x = jax.random.normal(kx, (8, 4), jnp.float32)       # flattens to (1, 32)
    probs = policy_net(x, packed, state_space=state_space, action_space=action_space)
    jax.block_until_ready(probs)

    xf = x.reshape(1, -1)
    ref = jax.nn.softmax(jnp.maximum(xf @ w1 + b1, 0.0) @ w2 + b2, axis=-1)
    assert probs.shape == (1, action_space)
    assert jnp.allclose(probs, ref, atol=1e-5), (probs, ref)
    assert jnp.allclose(jnp.sum(probs), 1.0, atol=1e-5)

    # --- batched forward (amortizes launch + param DMA over many env states) ---
    B = 12
    xs = jax.random.normal(kb, (B, state_space), jnp.float32)
    probs_b = policy_net_batch(xs, packed, state_space=state_space,
                               action_space=action_space)
    jax.block_until_ready(probs_b)

    ref_b = jax.nn.softmax(jnp.maximum(xs @ w1 + b1, 0.0) @ w2 + b2, axis=-1)
    assert probs_b.shape == (B, action_space)
    assert jnp.allclose(probs_b, ref_b, atol=1e-5), (probs_b, ref_b)
    assert jnp.allclose(jnp.sum(probs_b, axis=-1), 1.0, atol=1e-5)

    print("KERNEL_OK")
</pallas_src>

<mosaic_0001>
module attributes {stable_mosaic.version = 11 : i64} {
  func.func @_policy_kernel(%arg0: i32, %arg1: memref<8x32xf32, #tpu.memory_space<vmem>>, %arg2: memref<176x128xf32, #tpu.memory_space<vmem>>, %arg3: memref<8x128xf32, #tpu.memory_space<vmem>>) attributes {dimension_semantics = [#tpu.dimension_semantics<parallel>], iteration_bounds = array<i64: 1>, scalar_prefetch = 0 : i64, scratch_operands = 0 : i64, tpu.core_type = #tpu.core_type<tc>, window_params = [{transform_indices = @transform_0, window_bounds = array<i64: 8, 32>}, {pipeline_mode = #tpu.pipeline_mode<synchronous>, transform_indices = @transform_1, window_bounds = array<i64: 176, 128>}, {transform_indices = @transform_2, window_bounds = array<i64: 8, 128>}]} {
    %c0 = arith.constant 0 : index
    %c0_0 = arith.constant 0 : index
    %0 = vector.load %arg2[%c0, %c0_0] : memref<176x128xf32, #tpu.memory_space<vmem>>, vector<32x128xf32>
    %c32 = arith.constant 32 : index
    %c0_1 = arith.constant 0 : index
    %1 = vector.load %arg2[%c32, %c0_1] : memref<176x128xf32, #tpu.memory_space<vmem>>, vector<1x128xf32>
    %c40 = arith.constant 40 : index
    %c0_2 = arith.constant 0 : index
    %2 = vector.load %arg2[%c40, %c0_2] : memref<176x128xf32, #tpu.memory_space<vmem>>, vector<128x128xf32>
    %c168 = arith.constant 168 : index
    %c0_3 = arith.constant 0 : index
    %3 = vector.load %arg2[%c168, %c0_3] : memref<176x128xf32, #tpu.memory_space<vmem>>, vector<1x128xf32>
    %c0_4 = arith.constant 0 : index
    %c0_5 = arith.constant 0 : index
    %4 = vector.load %arg1[%c0_4, %c0_5] : memref<8x32xf32, #tpu.memory_space<vmem>>, vector<8x32xf32>
    %cst = arith.constant dense<0.000000e+00> : vector<8x128xf32>
    %5 = tpu.matmul %4, %0, %cst {dimension_numbers = #tpu.dot_dimension_numbers<[1], [0], [0], [1], [0, 0, 1, 1], [], []>} : vector<8x32xf32>, vector<32x128xf32>, vector<8x128xf32> -> vector<8x128xf32>
    %6 = vector.broadcast %1 : vector<1x128xf32> to vector<8x128xf32>
    %7 = arith.addf %5, %6 : vector<8x128xf32>
    %cst_6 = arith.constant 0.000000e+00 : f32
    %8 = vector.broadcast %cst_6 : f32 to vector<8x128xf32>
    %9 = arith.maximumf %7, %8 : vector<8x128xf32>
    %cst_7 = arith.constant dense<0.000000e+00> : vector<8x128xf32>
    %10 = tpu.matmul %9, %2, %cst_7 {dimension_numbers = #tpu.dot_dimension_numbers<[1], [0], [0], [1], [0, 0, 1, 1], [], []>} : vector<8x128xf32>, vector<128x128xf32>, vector<8x128xf32> -> vector<8x128xf32>
    %11 = vector.broadcast %3 : vector<1x128xf32> to vector<8x128xf32>
    %12 = arith.addf %10, %11 : vector<8x128xf32>
    %cst_8 = arith.constant dense<0xFF800000> : vector<8xf32>
    %13 = vector.multi_reduction <maximumf>, %12, %cst_8 [1] : vector<8x128xf32> to vector<8xf32>
    %14 = vector.shape_cast %13 : vector<8xf32> to vector<8x1xf32>
    %15 = vector.broadcast %14 : vector<8x1xf32> to vector<8x128xf32>
    %16 = arith.subf %12, %15 : vector<8x128xf32>
    %17 = math.exp %16 : vector<8x128xf32>
    %cst_9 = arith.constant dense<0.000000e+00> : vector<8xf32>
    %18 = vector.multi_reduction <add>, %17, %cst_9 [1] : vector<8x128xf32> to vector<8xf32>
    %19 = vector.shape_cast %18 : vector<8xf32> to vector<8x1xf32>
    %20 = vector.broadcast %19 : vector<8x1xf32> to vector<8x128xf32>
    %21 = arith.divf %17, %20 : vector<8x128xf32>
    %c0_10 = arith.constant 0 : index
    %c0_11 = arith.constant 0 : index
    %22 = vector.load %arg3[%c0_10, %c0_11] : memref<8x128xf32, #tpu.memory_space<vmem>>, vector<8x128xf32>
    tpu.vector_store %arg3[%c0_10, %c0_11], %21 {strides = array<i32>} : memref<8x128xf32, #tpu.memory_space<vmem>>, vector<8x128xf32>,
    return
  }
  func.func @transform_0(%arg0: i32) -> (i32, i32) {
    %c0_i32 = arith.constant 0 : i32
    %c0_i32_0 = arith.constant 0 : i32
    return %arg0, %c0_i32 : i32, i32
  }
  func.func @transform_1(%arg0: i32) -> (i32, i32) {
    %c0_i32 = arith.constant 0 : i32
    %c0_i32_0 = arith.constant 0 : i32
    %c0_i32_1 = arith.constant 0 : i32
    return %c0_i32, %c0_i32_0 : i32, i32
  }
  func.func @transform_2(%arg0: i32) -> (i32, i32) {
    %c0_i32 = arith.constant 0 : i32
    %c0_i32_0 = arith.constant 0 : i32
    return %arg0, %c0_i32 : i32, i32
  }
}

</mosaic_0001>

<bundles_post_ra>
// kernel: tpu_custom_call.1
= control target key start
LH: loop header
LB: loop body
LE: loop exit
PB: predicated region body
PF: predicated region fallthrough
CT: control target
= control target key end

     0   :  { %7 = vsyncpa [#allocation3], 0  ;;  %s441_s0 = inlined_call_operand.hbm [shape: f32[8,32], index: 0, kind: input, shape index: {}]   ;;  %s442_s1 = inlined_call_operand.hbm [shape: f32[176,128], index: 1, kind: input, shape index: {}]   ;;  %s443_s2 = inlined_call_operand.hbm [shape: f32[8,128], index: 2, kind: output, shape index: {}]  }
   0x1   :  { %8 = vsyncpa [#allocation6], 0 }
   0x2   :  { %9 = vsyncpa [#allocation4], 0  ;;  %s388_s9 = smov [#allocation2]   ;;  %s389_s11 = smov [#allocation5]  }
   0x3   :  { %s16_s10 = sshll.u32 %s388_s9, 4  ;;  %s25_s12 = sshll.u32 %s389_s11, 4  ;;  %s17_s10 = int_to_ptr.vmem [resolvable:$true] %s16_s10  ;;  %s26_s12 = int_to_ptr.vmem [resolvable:$true] %s25_s12 }
   0x4   :  { %s330_s13 = scalar_lea.vmem %s17_s10, 128  ;;  %p335_p1 = scmp.lt.s32.totalorder %s17_s10, %s17_s10 }
   0x5   :  { %p331_p0 = scmp.ne.s32.totalorder %s17_s10, %s330_s13  ;;  %p336_p2 = scmp.lt.s32.totalorder %s330_s13, %s330_s13 }
   0x7   :  { %p337_p3 = por %p336_p2, %p335_p1 }
   0x9   :  { %p338_p4 = pnand %p337_p3, %p331_p0 }
   0xb   :  { %341 = shalt.err (!%p338_p4)
}
   0xc   :  { %19 = dma.hbm_to_vmem [thread:$0]  %s441_s0, 128, %s17_s10, [#allocation3]  }
   0xd   :  { %s350_s16 = scalar_lea.vmem %s26_s12, 2816  ;;  %p355_p6 = scmp.lt.s32.totalorder %s26_s12, %s26_s12 }
   0xe   :  { %p351_p5 = scmp.ne.s32.totalorder %s26_s12, %s350_s16  ;;  %p356_p7 = scmp.lt.s32.totalorder %s350_s16, %s350_s16 }
  0x10   :  { %p357_p8 = por %p356_p7, %p355_p6 }
  0x12   :  { %p358_p9 = pnand %p357_p8, %p351_p5 }
  0x14   :  { %361 = shalt.err (!%p358_p9)
}
  0x15   :  { %s390_s17 = smov 128   ;;  %s391_s18 = smov 8  }
  0x16   :  { %31 = dma.hbm_to_vmem [thread:$0]  %s442_s1, 2816, %s26_s12, [#allocation6], %s390_s17, %s390_s17, %s391_s18  }
  0x17   :  { %382 = dma.done.wait [#allocation3], 128  }
  0x18   :  { %383 = vsyncadd [#allocation3], 4294967168 }
  0x19   :  { %384 = dma.done.wait [#allocation6], 2816  }
  0x1a   :  { %385 = vsyncadd [#allocation6], 4294964480  ;;  %v392_v0 = vmov 0.0   ;;  %vm393_vm0 = vmmov 0   ;;  %v41_v1 = vld [vmem:[#allocation5 + $0x18] sm:$0xff]  ;;  %v40_v2 = vld [vmem:[#allocation5 + $0x10] sm:$0xff] }
  0x1b   :  { %265 = vmatprep.subr.mxu0 %v392_v0  ;;  %273 = vmatprep.mubr.msk.f32.mxu0 %vm393_vm0, %v392_v0  ;;  %v58_v3 = vld [vmem:[#allocation5 + $0xa0] sm:$0xff]  ;;  %v39_v4 = vld [vmem:[#allocation5 + $0x8] sm:$0xff]  ;;  %v57_v5 = vld [vmem:[#allocation5 + $0x98] sm:$0xff]  ;;  %vm65_vm1 = vcmask 261120   ;;  %s394_s0 = smov [#allocation7]  }
  0x1c   :  { %276 = vmatprep.subr.mxu1 %v392_v0  ;;  %308 = vmatprep.mubr.msk.f32.mxu1 %vm393_vm0, %v392_v0  ;;  %v56_v6 = vld [vmem:[#allocation5 + $0x90] sm:$0xff]  ;;  %v38_v7 = vld [vmem:[#allocation5] sm:$0xff]  ;;  %v60_v8 = vld [vmem:[#allocation2] sm:$0xff]  ;;  %s230_s1 = sshll.u32 %s394_s0, 4  ;;  %s231_s1 = int_to_ptr.vmem [resolvable:$true] %s230_s1 }
  0x1d   :  { %266 = vmatpush3.msra.mxu0 %v41_v1  ;;  %277 = vmatpush3.msra.mxu1 %v58_v3  ;;  %v55_v9 = vld [vmem:[#allocation5 + $0x88] sm:$0xff]  ;;  %v54_v10 = vld [vmem:[#allocation5 + $0x80] sm:$0xff]  ;;  %v53_v11 = vld [vmem:[#allocation5 + $0x78] sm:$0xff]  ;;  %s362_s21 = scalar_lea.vmem %s231_s1, 128  ;;  %p367_p11 = scmp.lt.s32.totalorder %s231_s1, %s231_s1 }
  0x1e   :  { %267 = vmatprep.subr.mxu0 %v392_v0  ;;  %278 = vmatprep.subr.mxu1 %v392_v0  ;;  %v52_v12 = vld [vmem:[#allocation5 + $0x70] sm:$0xff]  ;;  %v51_v13 = vld [vmem:[#allocation5 + $0x68] sm:$0xff]  ;;  %v50_v14 = vld [vmem:[#allocation5 + $0x60] sm:$0xff]  ;;  %p363_p10 = scmp.ne.s32.totalorder %s231_s1, %s362_s21  ;;  %p368_p12 = scmp.lt.s32.totalorder %s362_s21, %s362_s21 }
  0x1f   :  { %268 = vmatpush3.msra.mxu0 %v40_v2  ;;  %279 = vmatpush3.msra.mxu1 %v57_v5  ;;  %v49_v15 = vld [vmem:[#allocation5 + $0x58] sm:$0xff]  ;;  %v48_v16 = vld [vmem:[#allocation5 + $0x50] sm:$0xff]  ;;  %v47_v17 = vld [vmem:[#allocation5 + $0x48] sm:$0xff] }
  0x20   :  { %269 = vmatprep.subr.mxu0 %v392_v0  ;;  %280 = vmatprep.subr.mxu1 %v392_v0  ;;  %v46_v18 = vld [vmem:[#allocation5 + $0x40] sm:$0xff]  ;;  %v45_v19 = vld [vmem:[#allocation5 + $0x38] sm:$0xff]  ;;  %v44_v20 = vld [vmem:[#allocation5 + $0x30] sm:$0xff]  ;;  %p369_p13 = por %p368_p12, %p367_p11 }
  0x21   :  { %270 = vmatpush3.msra.mxu0 %v39_v4  ;;  %281 = vmatpush3.msra.mxu1 %v56_v6  ;;  %v43_v21 = vld [vmem:[#allocation5 + $0x28] sm:$0xff]  ;;  %v240_v22 = vld [vmem:[#allocation5 + $0x20] ss:$0 sm:$0xff] }
  0x22   :  { %271 = vmatprep.subr.mxu0 %v392_v0  ;;  %282 = vmatprep.subr.mxu1 %v392_v0  ;;  %v242_v27 = vld [vmem:[#allocation5 + $0xa8] ss:$0 sm:$0xff]  ;;  %p370_p0 = pnand %p369_p13, %p363_p10 }
  0x23   :  { %272 = vmatpush3.msra.mxu0 %v38_v7  ;;  %283 = vmatpush3.msra.mxu1 %v55_v9 }
  0x24   :  { %274 = vmatmul.mubr.msk.f32.vlgmr.msra.gmra.mxu0 %vm65_vm1, %v60_v8  ;;  %284 = vmatprep.subr.mxu1 %v392_v0 }
  0x25   :  { %285 = vmatpush3.msra.mxu1 %v54_v10 }
  0x26   :  { %286 = vmatprep.subr.mxu1 %v392_v0 }
  0x27   :  { %287 = vmatpush3.msra.mxu1 %v53_v11 }
  0x28   :  { %288 = vmatprep.subr.mxu1 %v392_v0 }
  0x29   :  { %289 = vmatpush3.msra.mxu1 %v52_v12 }
  0x2a   :  { %290 = vmatprep.subr.mxu1 %v392_v0 }
  0x2b   :  { %291 = vmatpush3.msra.mxu1 %v51_v13 }
  0x2c   :  { %292 = vmatprep.subr.mxu1 %v392_v0 }
  0x2d   :  { %293 = vmatpush3.msra.mxu1 %v50_v14 }
  0x2e   :  { %294 = vmatprep.subr.mxu1 %v392_v0 }
  0x2f   :  { %295 = vmatpush3.msra.mxu1 %v49_v15 }
  0x30   :  { %296 = vmatprep.subr.mxu1 %v392_v0 }
  0x31   :  { %297 = vmatpush3.msra.mxu1 %v48_v16 }
  0x32   :  { %298 = vmatprep.subr.mxu1 %v392_v0 }
  0x33   :  { %299 = vmatpush3.msra.mxu1 %v47_v17 }
  0x34   :  { %300 = vmatprep.subr.mxu1 %v392_v0 }
  0x35   :  { %301 = vmatpush3.msra.mxu1 %v46_v18 }
  0x36   :  { %302 = vmatprep.subr.mxu1 %v392_v0 }
  0x37   :  { %303 = vmatpush3.msra.mxu1 %v45_v19 }
  0x38   :  { %304 = vmatprep.subr.mxu1 %v392_v0 }
  0x39   :  { %305 = vmatpush3.msra.mxu1 %v44_v20 }
  0x3a   :  { %306 = vmatprep.subr.mxu1 %v392_v0 }
  0x3b   :  { %307 = vmatpush3.msra.mxu1 %v43_v21 }
  0xe4   :  { %v135_v23 = vpop.f32.mrf.mxu0 }
  0xe5   :  { %v136_v24 = vadd.f32 %v240_v22, %v135_v23 }
  0xe6   :  { %v275_v25 = vpop.f32.mrf.mxu0 }
  0xe7   :  { %v139_v26 = vmax.f32 %v136_v24, 0.0 }
  0xe9   :  { %309 = vmatmul.mubr.f32.vlgmr.msra.gmra.mxu1 %v139_v26 }
 0x1a9   :  { %v210_v28 = vpop.f32.mrf.mxu1 }
 0x1aa   :  { %v211_v29 = vadd.f32 %v242_v27, %v210_v28 }
 0x1ab   :  { %v310_v30 = vpop.f32.mrf.mxu1 }
 0x1ac   :  { %214 = vmax.xlane.f32.xlu0 %v211_v29 }
 0x235   :  { %v215_v31 = vpop.xlane.xlu0 %214 }
 0x236   :  { %v216_v32 = vsub.f32 %v211_v29, %v215_v31 }
 0x238   :  { %v217_v33 = vmul.f32 1.442695, %v216_v32 }
 0x23a   :  { %318 = vpow2.f32 %v217_v33 }
 0x247   :  { %v319_v34 = vpop.eup %318 }
 0x248   :  { %219 = vadd.xlane.f32.xlu0 %v319_v34 }
 0x2d1   :  { %v220_v35 = vpop.xlane.xlu0 %219 }
 0x2d2   :  { %320 = vrcp.f32 %v220_v35 }
 0x2df   :  { %v321_v36 = vpop.eup %320 }
 0x2e0   :  { %v222_v37 = vmul.f32 %v321_v36, %v319_v34 }
 0x2e2   :  { %223 = vst [vmem:[#allocation7] sm:$0xff] %v222_v37 }
 0x2e3   :  { %373 = shalt.err (!%p370_p0)
}
 0x2e4   :  { %233 = dma.vmem_to_hbm [thread:$0]  %s231_s1, 128, %s443_s2, [#allocation4]  }
 0x2e5   :  { %386 = dma.done.wait [#allocation4], 128  }
 0x2e6   :  { %387 = vsyncadd [#allocation4], 4294967168 }
 0x2e7   :  { %237 = vsyncpa [#allocation3], 1 }
 0x2e8   :  { %238 = vsyncpa [#allocation6], 1 }
 0x2e9   :  { %239 = vsyncpa [#allocation4], 1 }

</bundles_post_ra>
